<compile_context>
chip_gen: v7x
topology: tpu7x:2x2x1
jax: 0.10.0
libtpu: 0.0.40
codegen_flags: <defaults>
</compile_context>

<pallas_src>
import functools

import jax
import jax.numpy as jnp
from jax.experimental import pallas as pl
from jax.experimental.pallas import tpu as pltpu

_LANE = 128     # TPU lane width (last vreg dim)
_SUBLANE = 8    # f32 sublane width (second-to-last vreg dim)


def _round_up(n, m):
    return (n + m - 1) // m * m


def _mlp_kernel(x_ref, w1_ref, b1_ref, w2_ref, b2_ref, w3_ref, b3_ref, o_ref):
    """Fused 3-layer MLP tile.  Matmul inputs in weight dtype (bf16 or f32),
    f32 MXU accumulation, bias-add/ReLU in f32."""
    cdt = w1_ref.dtype
    x = x_ref[...].astype(cdt)
    # Layer 1: Linear(in, 128) + ReLU
    h1 = jnp.dot(x, w1_ref[...], preferred_element_type=jnp.float32)
    h1 = jnp.maximum(h1 + b1_ref[...], 0.0)
    # Layer 2: Linear(128, 64 -> padded to 128 lanes) + ReLU (padded cols stay 0)
    h2 = jnp.dot(h1.astype(cdt), w2_ref[...], preferred_element_type=jnp.float32)
    h2 = jnp.maximum(h2 + b2_ref[...], 0.0)
    # Layer 3: Linear(64 -> padded, out padded to 128 lanes), no activation
    out = jnp.dot(h2.astype(cdt), w3_ref[...], preferred_element_type=jnp.float32)
    o_ref[...] = (out + b3_ref[...]).astype(o_ref.dtype)


@functools.partial(jax.jit, static_argnames=("tile_m",))
def dq_network_forward(x, params, *, tile_m=None):
    """Forward pass of DQNetwork.

    x: (B, input_size) float32
    params: dict with w1 (in,128), b1 (1,128), w2 (128,64), b2 (1,64),
            w3 (64,out), b3 (1,out).  Weights are (in_features, out_features),
            i.e. the transpose of PyTorch nn.Linear, so the kernel does x @ W.
    returns: (B, output_size) float32
    """
    B, in_size = x.shape
    w1, b1 = params["w1"], params["b1"]
    w2, b2 = params["w2"], params["b2"]
    w3, b3 = params["w3"], params["b3"]
    h1_dim = w1.shape[1]                  # 128 (already lane-aligned)
    h2_dim = w2.shape[1]                  # 64
    out_size = w3.shape[1]

    # ---- Lane-dense padding (zero columns/rows => result unchanged) --------
    h2_pad = _round_up(h2_dim, _LANE)     # 64 -> 128 (internal hidden width)
    out_pad = _round_up(out_size, _LANE)  # e.g. 4 -> 128 (sliced back below)
    w2p = jnp.pad(w2, ((0, 0), (0, h2_pad - h2_dim)))
    b2p = jnp.pad(b2.astype(jnp.float32), ((0, 0), (0, h2_pad - h2_dim)))
    w3p = jnp.pad(w3, ((0, h2_pad - h2_dim), (0, out_pad - out_size)))
    b3p = jnp.pad(b3.astype(jnp.float32), ((0, 0), (0, out_pad - out_size)))
    b1f = b1.astype(jnp.float32)

    # ---- Batch tiling -------------------------------------------------------
    # Small B: one grid step, whole x/out resident in VMEM (no pipeline cost).
    # Large B: 1024-row tiles -> MXU M dimension is full and the per-step
    # overhead is amortized; double-buffered x/out tiles stay well under the
    # 32 MiB scoped-VMEM default (and v7x's 64 MiB physical VMEM).
    if tile_m is None:
        tile_m = B if B <= 1024 else 1024
    tile_m = max(_SUBLANE, _round_up(min(tile_m, max(B, 1)), _SUBLANE))
    B_pad = _round_up(B, tile_m)
    xp = jnp.pad(x, ((0, B_pad - B), (0, 0))) if B_pad != B else x
    grid = (B_pad // tile_m,)

    flops = 2 * B_pad * (in_size * h1_dim + h1_dim * h2_pad + h2_pad * out_pad)
    bytes_accessed = (
        xp.size * xp.dtype.itemsize
        + sum(int(a.size) * a.dtype.itemsize
              for a in (w1, b1f, w2p, b2p, w3p, b3p))
        + B_pad * out_pad * 4
    )

    out = pl.pallas_call(
        _mlp_kernel,
        out_shape=jax.ShapeDtypeStruct((B_pad, out_pad), jnp.float32),
        grid_spec=pltpu.PrefetchScalarGridSpec(
            num_scalar_prefetch=0,
            grid=grid,
            in_specs=[
                # activations: tiled along batch (sublane-aligned rows)
                pl.BlockSpec((tile_m, in_size), lambda i: (i, 0)),
                # weights / biases: full blocks, identical for every grid step
                pl.BlockSpec((in_size, h1_dim), lambda i: (0, 0)),
                pl.BlockSpec((1, h1_dim), lambda i: (0, 0)),
                pl.BlockSpec((h1_dim, h2_pad), lambda i: (0, 0)),
                pl.BlockSpec((1, h2_pad), lambda i: (0, 0)),
                pl.BlockSpec((h2_pad, out_pad), lambda i: (0, 0)),
                pl.BlockSpec((1, out_pad), lambda i: (0, 0)),
            ],
            out_specs=pl.BlockSpec((tile_m, out_pad), lambda i: (i, 0)),
        ),
        compiler_params=pltpu.CompilerParams(
            dimension_semantics=("parallel",),   # shards batch tiles on v7x's 2 TCs
        ),
        cost_estimate=pl.CostEstimate(
            flops=flops, transcendentals=0, bytes_accessed=bytes_accessed),
    )(xp, w1, b1f, w2p, b2p, w3p, b3p)

    return out[:B, :out_size]


def init_params(key, input_size, output_size, weight_dtype=jnp.bfloat16):
    """nn.Linear default init (U[-1/sqrt(fan_in), 1/sqrt(fan_in)]).

    Weights stored (in_features, out_features) — the transpose of PyTorch's
    (out_features, in_features) — so the kernel computes x @ W.
    Weights are stored in `weight_dtype` (bf16 by default: MXU-native on
    v6e/v7x, half the DMA bytes); biases stay f32 (bias-add/ReLU run in f32).
    """
    dims = [(input_size, 128), (128, 64), (64, output_size)]
    params = {}
    for idx, (fan_in, fan_out) in enumerate(dims, start=1):
        key, kw, kb = jax.random.split(key, 3)
        bound = 1.0 / jnp.sqrt(jnp.float32(fan_in))
        w = jax.random.uniform(kw, (fan_in, fan_out), jnp.float32, -bound, bound)
        b = jax.random.uniform(kb, (1, fan_out), jnp.float32, -bound, bound)
        params[f"w{idx}"] = w.astype(weight_dtype)
        params[f"b{idx}"] = b  # f32
    return params


def reference_forward(x, params):
    """Pure-JAX reference, numerically consistent with the kernel
    (matmul inputs in the weight dtype, f32 accumulation, f32 bias/ReLU)."""
    wdt = params["w1"].dtype

    def lin(h, w, b):
        y = jnp.dot(h.astype(wdt), w, preferred_element_type=jnp.float32)
        return y + b.astype(jnp.float32)

    h1 = jnp.maximum(lin(x, params["w1"], params["b1"]), 0.0)
    h2 = jnp.maximum(lin(h1, params["w2"], params["b2"]), 0.0)
    return lin(h2, params["w3"], params["b3"])


if __name__ == "__main__":
    input_size = 32   # state feature dimension
    output_size = 4   # number of discrete actions
    batch = 16

    key = jax.random.PRNGKey(0)
    key, kx = jax.random.split(key)
    x = jax.random.normal(kx, (batch, input_size), jnp.float32)

    # Default path: bf16 weights (v6e/v7x MXU-native), f32 accumulation.
    params_bf16 = init_params(key, input_size, output_size, weight_dtype=jnp.bfloat16)
    out = jax.block_until_ready(dq_network_forward(x, params_bf16))
    ref = reference_forward(x, params_bf16)
    assert out.shape == (batch, output_size)
    assert jnp.allclose(out, ref, atol=1e-2, rtol=1e-2), "bf16 mismatch vs reference"

    # f32-weight path (exactness check; also the natural choice on v5e).
    params_f32 = init_params(key, input_size, output_size, weight_dtype=jnp.float32)
    out32 = jax.block_until_ready(dq_network_forward(x, params_f32))
    ref32 = reference_forward(x, params_f32)
    assert jnp.allclose(out32, ref32, atol=1e-4, rtol=1e-4), "f32 mismatch vs reference"

    # Non-divisible batch + multi-tile grid path (padding + slicing).
    xb = jax.random.normal(kx, (300, input_size), jnp.float32)
    outb = jax.block_until_ready(dq_network_forward(xb, params_f32, tile_m=128))
    refb = reference_forward(xb, params_f32)
    assert outb.shape == (300, output_size)
    assert jnp.allclose(outb, refb, atol=1e-4, rtol=1e-4), "tiled mismatch vs reference"

    print("KERNEL_OK")
</pallas_src>

<mosaic_0001>
module attributes {stable_mosaic.version = 11 : i64} {
  func.func @_mlp_kernel(%arg0: i32, %arg1: memref<16x32xf32, #tpu.memory_space<vmem>>, %arg2: memref<32x128xbf16, #tpu.memory_space<vmem>>, %arg3: memref<1x128xf32, #tpu.memory_space<vmem>>, %arg4: memref<128x128xbf16, #tpu.memory_space<vmem>>, %arg5: memref<1x128xf32, #tpu.memory_space<vmem>>, %arg6: memref<128x128xbf16, #tpu.memory_space<vmem>>, %arg7: memref<1x128xf32, #tpu.memory_space<vmem>>, %arg8: memref<16x128xf32, #tpu.memory_space<vmem>>) attributes {dimension_semantics = [#tpu.dimension_semantics<parallel>], iteration_bounds = array<i64: 1>, scalar_prefetch = 0 : i64, scratch_operands = 0 : i64, tpu.core_type = #tpu.core_type<tc>, window_params = [{transform_indices = @transform_0, window_bounds = array<i64: 16, 32>}, {pipeline_mode = #tpu.pipeline_mode<synchronous>, transform_indices = @transform_1, window_bounds = array<i64: 32, 128>}, {pipeline_mode = #tpu.pipeline_mode<synchronous>, transform_indices = @transform_2, window_bounds = array<i64: 1, 128>}, {pipeline_mode = #tpu.pipeline_mode<synchronous>, transform_indices = @transform_3, window_bounds = array<i64: 128, 128>}, {pipeline_mode = #tpu.pipeline_mode<synchronous>, transform_indices = @transform_4, window_bounds = array<i64: 1, 128>}, {pipeline_mode = #tpu.pipeline_mode<synchronous>, transform_indices = @transform_5, window_bounds = array<i64: 128, 128>}, {pipeline_mode = #tpu.pipeline_mode<synchronous>, transform_indices = @transform_6, window_bounds = array<i64: 1, 128>}, {transform_indices = @transform_7, window_bounds = array<i64: 16, 128>}]} {
    %c0 = arith.constant 0 : index
    %c0_0 = arith.constant 0 : index
    %0 = vector.load %arg1[%c0, %c0_0] : memref<16x32xf32, #tpu.memory_space<vmem>>, vector<16x32xf32>
    %1 = arith.truncf %0 : vector<16x32xf32> to vector<16x32xbf16>
    %c0_1 = arith.constant 0 : index
    %c0_2 = arith.constant 0 : index
    %2 = vector.load %arg2[%c0_1, %c0_2] : memref<32x128xbf16, #tpu.memory_space<vmem>>, vector<32x128xbf16>
    %cst = arith.constant dense<0.000000e+00> : vector<16x128xf32>
    %3 = tpu.matmul %1, %2, %cst {dimension_numbers = #tpu.dot_dimension_numbers<[1], [0], [0], [1], [0, 0, 1, 1], [], []>} : vector<16x32xbf16>, vector<32x128xbf16>, vector<16x128xf32> -> vector<16x128xf32>
    %c0_3 = arith.constant 0 : index
    %c0_4 = arith.constant 0 : index
    %4 = vector.load %arg3[%c0_3, %c0_4] : memref<1x128xf32, #tpu.memory_space<vmem>>, vector<1x128xf32>
    %5 = vector.broadcast %4 : vector<1x128xf32> to vector<16x128xf32>
    %6 = arith.addf %3, %5 : vector<16x128xf32>
    %cst_5 = arith.constant 0.000000e+00 : f32
    %7 = vector.broadcast %cst_5 : f32 to vector<16x128xf32>
    %8 = arith.maximumf %6, %7 : vector<16x128xf32>
    %9 = arith.truncf %8 : vector<16x128xf32> to vector<16x128xbf16>
    %c0_6 = arith.constant 0 : index
    %c0_7 = arith.constant 0 : index
    %10 = vector.load %arg4[%c0_6, %c0_7] : memref<128x128xbf16, #tpu.memory_space<vmem>>, vector<128x128xbf16>
    %cst_8 = arith.constant dense<0.000000e+00> : vector<16x128xf32>
    %11 = tpu.matmul %9, %10, %cst_8 {dimension_numbers = #tpu.dot_dimension_numbers<[1], [0], [0], [1], [0, 0, 1, 1], [], []>} : vector<16x128xbf16>, vector<128x128xbf16>, vector<16x128xf32> -> vector<16x128xf32>
    %c0_9 = arith.constant 0 : index
    %c0_10 = arith.constant 0 : index
    %12 = vector.load %arg5[%c0_9, %c0_10] : memref<1x128xf32, #tpu.memory_space<vmem>>, vector<1x128xf32>
    %13 = vector.broadcast %12 : vector<1x128xf32> to vector<16x128xf32>
    %14 = arith.addf %11, %13 : vector<16x128xf32>
    %cst_11 = arith.constant 0.000000e+00 : f32
    %15 = vector.broadcast %cst_11 : f32 to vector<16x128xf32>
    %16 = arith.maximumf %14, %15 : vector<16x128xf32>
    %17 = arith.truncf %16 : vector<16x128xf32> to vector<16x128xbf16>
    %c0_12 = arith.constant 0 : index
    %c0_13 = arith.constant 0 : index
    %18 = vector.load %arg6[%c0_12, %c0_13] : memref<128x128xbf16, #tpu.memory_space<vmem>>, vector<128x128xbf16>
    %cst_14 = arith.constant dense<0.000000e+00> : vector<16x128xf32>
    %19 = tpu.matmul %17, %18, %cst_14 {dimension_numbers = #tpu.dot_dimension_numbers<[1], [0], [0], [1], [0, 0, 1, 1], [], []>} : vector<16x128xbf16>, vector<128x128xbf16>, vector<16x128xf32> -> vector<16x128xf32>
    %c0_15 = arith.constant 0 : index
    %c0_16 = arith.constant 0 : index
    %20 = vector.load %arg7[%c0_15, %c0_16] : memref<1x128xf32, #tpu.memory_space<vmem>>, vector<1x128xf32>
    %21 = vector.broadcast %20 : vector<1x128xf32> to vector<16x128xf32>
    %22 = arith.addf %19, %21 : vector<16x128xf32>
    %c0_17 = arith.constant 0 : index
    %c0_18 = arith.constant 0 : index
    %23 = vector.load %arg8[%c0_17, %c0_18] : memref<16x128xf32, #tpu.memory_space<vmem>>, vector<16x128xf32>
    tpu.vector_store %arg8[%c0_17, %c0_18], %22 {strides = array<i32>} : memref<16x128xf32, #tpu.memory_space<vmem>>, vector<16x128xf32>,
    return
  }
  func.func @transform_0(%arg0: i32) -> (i32, i32) {
    %c0_i32 = arith.constant 0 : i32
    %c0_i32_0 = arith.constant 0 : i32
    return %arg0, %c0_i32 : i32, i32
  }
  func.func @transform_1(%arg0: i32) -> (i32, i32) {
    %c0_i32 = arith.constant 0 : i32
    %c0_i32_0 = arith.constant 0 : i32
    %c0_i32_1 = arith.constant 0 : i32
    return %c0_i32, %c0_i32_0 : i32, i32
  }
  func.func @transform_2(%arg0: i32) -> (i32, i32) {
    %c0_i32 = arith.constant 0 : i32
    %c0_i32_0 = arith.constant 0 : i32
    %c0_i32_1 = arith.constant 0 : i32
    return %c0_i32, %c0_i32_0 : i32, i32
  }
  func.func @transform_3(%arg0: i32) -> (i32, i32) {
    %c0_i32 = arith.constant 0 : i32
    %c0_i32_0 = arith.constant 0 : i32
    %c0_i32_1 = arith.constant 0 : i32
    return %c0_i32, %c0_i32_0 : i32, i32
  }
  func.func @transform_4(%arg0: i32) -> (i32, i32) {
    %c0_i32 = arith.constant 0 : i32
    %c0_i32_0 = arith.constant 0 : i32
    %c0_i32_1 = arith.constant 0 : i32
    return %c0_i32, %c0_i32_0 : i32, i32
  }
  func.func @transform_5(%arg0: i32) -> (i32, i32) {
    %c0_i32 = arith.constant 0 : i32
    %c0_i32_0 = arith.constant 0 : i32
    %c0_i32_1 = arith.constant 0 : i32
    return %c0_i32, %c0_i32_0 : i32, i32
  }
  func.func @transform_6(%arg0: i32) -> (i32, i32) {
    %c0_i32 = arith.constant 0 : i32
    %c0_i32_0 = arith.constant 0 : i32
    %c0_i32_1 = arith.constant 0 : i32
    return %c0_i32, %c0_i32_0 : i32, i32
  }
  func.func @transform_7(%arg0: i32) -> (i32, i32) {
    %c0_i32 = arith.constant 0 : i32
    %c0_i32_0 = arith.constant 0 : i32
    return %arg0, %c0_i32 : i32, i32
  }
}

</mosaic_0001>

<bundles_post_ra>
// kernel: dq_network_forward.1
= control target key start
LH: loop header
LB: loop body
LE: loop exit
PB: predicated region body
PF: predicated region fallthrough
CT: control target
= control target key end

     0   :  { %v445_v0 = vmov 0.0   ;;  %vm446_vm0 = vmmov 0   ;;  %vm53_vm1 = vcmask 261120   ;;  %s586_s1 = inlined_call_operand.vmem [shape: bf16[32,128], index: 1, kind: input, shape index: {}]   ;;  %s587_s0 = inlined_call_operand.vmem [shape: f32[16,32], index: 0, kind: input, shape index: {}]   ;;  %s588_s3 = inlined_call_operand.vmem [shape: bf16[128,128], index: 3, kind: input, shape index: {}]   ;;  %s589_s5 = inlined_call_operand.vmem [shape: bf16[128,128], index: 5, kind: input, shape index: {}]   ;;  %s590_s2 = inlined_call_operand.vmem [shape: f32[1,128], index: 2, kind: input, shape index: {}]   ;;  %s591_s4 = inlined_call_operand.vmem [shape: f32[1,128], index: 4, kind: input, shape index: {}]   ;;  %s592_s6 = inlined_call_operand.vmem [shape: f32[1,128], index: 6, kind: input, shape index: {}]   ;;  %s593_s7 = inlined_call_operand.vmem [shape: f32[16,128], index: 7, kind: output, shape index: {}]  }
   0x1   :  { %377 = vmatprep.subr.bf16.mxu0 %v445_v0  ;;  %v427_v1 = vld [vmem:[%s586_s1] sm:$0xff]   ;;  %381 = vmatprep.mubr.msk.bf16.mxu0 %vm446_vm0, %v445_v0  ;;  %v428_v2 = vld [vmem:[%s586_s1 + $0x8] sm:$0xff]   ;;  %v431_v8 = vld [vmem:[%s588_s3 + $0x10] sm:$0xff]  }
   0x2   :  { %385 = vmatprep.subr.bf16.mxu1 %v445_v0  ;;  %401 = vmatprep.mubr.msk.bf16.mxu1 %vm446_vm0, %v445_v0  ;;  %v27_v3 = vld [vmem:[%s587_s0] sm:$0xff]  ;;  %v28_v4 = vld [vmem:[%s587_s0 + $0x8] sm:$0xff]  ;;  %v432_v9 = vld [vmem:[%s588_s3 + $0x18] sm:$0xff]  }
   0x3   :  { %378 = vmatpush3.bf16.msra.mxu0 %v427_v1  ;;  %v429_v5 = vld [vmem:[%s588_s3] sm:$0xff]   ;;  %v29_v6 = vpack.c.bf16 %v28_v4, %v27_v3  ;;  %v430_v7 = vld [vmem:[%s588_s3 + $0x8] sm:$0xff]   ;;  %v435_v12 = vld [vmem:[%s588_s3 + $0x30] sm:$0xff]  }
   0x4   :  { %379 = vmatprep.subr.bf16.mxu0 %v445_v0  ;;  %386 = vmatpush3.bf16.msra.mxu1 %v429_v5  ;;  %v433_v10 = vld [vmem:[%s588_s3 + $0x20] sm:$0xff]   ;;  %v434_v11 = vld [vmem:[%s588_s3 + $0x28] sm:$0xff]   ;;  %v436_v13 = vld [vmem:[%s588_s3 + $0x38] sm:$0xff]  }
   0x5   :  { %387 = vmatprep.subr.bf16.mxu1 %v445_v0  ;;  %v437_v14 = vld [vmem:[%s589_s5] sm:$0xff]   ;;  %v438_v15 = vld [vmem:[%s589_s5 + $0x8] sm:$0xff]   ;;  %v439_v16 = vld [vmem:[%s589_s5 + $0x10] sm:$0xff]  }
   0x6   :  { %v440_v17 = vld [vmem:[%s589_s5 + $0x18] sm:$0xff]   ;;  %v441_v18 = vld [vmem:[%s589_s5 + $0x20] sm:$0xff]   ;;  %v442_v19 = vld [vmem:[%s589_s5 + $0x28] sm:$0xff]  }
   0x7   :  { %380 = vmatpush3.bf16.msra.mxu0 %v428_v2  ;;  %v334_v20 = vld [vmem:[%s590_s2] ss:$0 sm:$0xff]  ;;  %v443_v30 = vld [vmem:[%s589_s5 + $0x30] sm:$0xff]   ;;  %v444_v31 = vld [vmem:[%s589_s5 + $0x38] sm:$0xff]  }
   0x8   :  { %405 = vmatprep.subr.bf16.mxu0 %v445_v0  ;;  %388 = vmatpush3.bf16.msra.mxu1 %v430_v7  ;;  %v338_v32 = vld [vmem:[%s591_s4] ss:$0 sm:$0xff] }
   0x9   :  { %389 = vmatprep.subr.bf16.mxu1 %v445_v0  ;;  %v347_v42 = vld [vmem:[%s592_s6] ss:$0 sm:$0xff] }
   0xa   :  { %382 = vmatmul.mubr.msk.bf16.vlgmr.msra.gmra.mrb[0].mxu0 %vm53_vm1, %v29_v6 }
   0xb   :  { %421 = vmatprep.mubr.msk.bf16.mxu0 %vm446_vm0, %v445_v0  ;;  %406 = vmatpush3.bf16.msra.mxu0 %v437_v14 }
   0xc   :  { %390 = vmatpush3.bf16.msra.mxu1 %v431_v8  ;;  %407 = vmatprep.subr.bf16.mxu0 %v445_v0 }
   0xd   :  { %391 = vmatprep.subr.bf16.mxu1 %v445_v0 }
   0xf   :  { %408 = vmatpush3.bf16.msra.mxu0 %v438_v15 }
  0x10   :  { %392 = vmatpush3.bf16.msra.mxu1 %v432_v9  ;;  %409 = vmatprep.subr.bf16.mxu0 %v445_v0 }
  0x11   :  { %393 = vmatprep.subr.bf16.mxu1 %v445_v0 }
  0x13   :  { %410 = vmatpush3.bf16.msra.mxu0 %v439_v16 }
  0x14   :  { %394 = vmatpush3.bf16.msra.mxu1 %v433_v10  ;;  %411 = vmatprep.subr.bf16.mxu0 %v445_v0 }
  0x15   :  { %395 = vmatprep.subr.bf16.mxu1 %v445_v0 }
  0x17   :  { %412 = vmatpush3.bf16.msra.mxu0 %v440_v17 }
  0x18   :  { %396 = vmatpush3.bf16.msra.mxu1 %v434_v11  ;;  %413 = vmatprep.subr.bf16.mxu0 %v445_v0 }
  0x19   :  { %397 = vmatprep.subr.bf16.mxu1 %v445_v0 }
  0x1b   :  { %414 = vmatpush3.bf16.msra.mxu0 %v441_v18 }
  0x1c   :  { %398 = vmatpush3.bf16.msra.mxu1 %v435_v12  ;;  %415 = vmatprep.subr.bf16.mxu0 %v445_v0 }
  0x1d   :  { %399 = vmatprep.subr.bf16.mxu1 %v445_v0 }
  0x1f   :  { %416 = vmatpush3.bf16.msra.mxu0 %v442_v19 }
  0x20   :  { %400 = vmatpush3.bf16.msra.mxu1 %v436_v13  ;;  %417 = vmatprep.subr.bf16.mxu0 %v445_v0 }
  0x23   :  { %418 = vmatpush3.bf16.msra.mxu0 %v443_v30 }
  0x24   :  { %419 = vmatprep.subr.bf16.mxu0 %v445_v0 }
  0x27   :  { %420 = vmatpush3.bf16.msra.mxu0 %v444_v31 }
  0xdd   :  { %v91_v21 = vpop.f32.mrb[0].mxu0 }
  0xde   :  { %v92_v22 = vadd.f32 %v334_v20, %v91_v21  ;;  %v383_v23 = vpop.f32.mrb[1].mxu0 }
  0xdf   :  { %v94_v24 = vpop.f32.mrb[2].mxu0 }
  0xe0   :  { %v95_v25 = vadd.f32 %v334_v20, %v94_v24  ;;  %v384_v26 = vpop.f32.mrb[3].mxu0  ;;  %v98_v27 = vmax.f32 %v92_v22, 0.0 }
  0xe2   :  { %v99_v28 = vmax.f32 %v95_v25, 0.0 }
  0xe4   :  { %v100_v29 = vpack.c.bf16 %v99_v28, %v98_v27 }
  0xe6   :  { %402 = vmatmul.mubr.bf16.vlgmr.msra.gmra.mrb[0].mxu1 %v100_v29 }
 0x1b9   :  { %v206_v33 = vpop.f32.mrb[0].mxu1 }
 0x1ba   :  { %v207_v34 = vadd.f32 %v338_v32, %v206_v33  ;;  %v403_v35 = vpop.f32.mrb[1].mxu1 }
 0x1bb   :  { %v209_v36 = vpop.f32.mrb[2].mxu1 }
 0x1bc   :  { %v210_v37 = vadd.f32 %v338_v32, %v209_v36  ;;  %v404_v38 = vpop.f32.mrb[3].mxu1  ;;  %v213_v39 = vmax.f32 %v207_v34, 0.0 }
 0x1be   :  { %v214_v40 = vmax.f32 %v210_v37, 0.0 }
 0x1c0   :  { %v215_v41 = vpack.c.bf16 %v214_v40, %v213_v39 }
 0x1c2   :  { %422 = vmatmul.mubr.bf16.vlgmr.msra.gmra.mrb[4].mxu0 %v215_v41 }
 0x295   :  { %v321_v43 = vpop.f32.mrb[4].mxu0 }
 0x296   :  { %v322_v44 = vadd.f32 %v347_v42, %v321_v43  ;;  %v423_v45 = vpop.f32.mrb[5].mxu0 }
 0x297   :  { %v324_v46 = vpop.f32.mrb[6].mxu0 }
 0x298   :  { %328 = vst [vmem:[%s593_s7] sm:$0xff] %v322_v44  ;;  %v325_v47 = vadd.f32 %v347_v42, %v324_v46  ;;  %v424_v48 = vpop.f32.mrb[7].mxu0 }
 0x29a   :  { %329 = vst [vmem:[%s593_s7 + $0x8] sm:$0xff] %v325_v47 }

</bundles_post_ra>
